<compile_context>
chip_gen: v7x
topology: tpu7x:2x2x1
jax: 0.10.0
libtpu: 0.0.40
codegen_flags: <defaults>
</compile_context>

<pallas_src>
import functools

import jax
import jax.numpy as jnp
import numpy as np
from jax.experimental import pallas as pl
from jax.experimental.pallas import tpu as pltpu


def _block_kernel(x_ref, m1_ref, b1_ref, m2_ref, b2_ref, out_ref, h_ref, *,
                  compute_dtype):
    # x_ref:   (NB, H, W*Cin)       activations, W and C folded into lanes
    # m1_ref:  (3, W*Cin,  W*Cout)  per-ky band matrices of conv1 weights
    # b1_ref:  (1, W*Cout)          conv1 bias tiled across W (f32)
    # m2_ref:  (3, W*Cout, W*Cout)  per-ky band matrices of conv2 weights
    # b2_ref:  (1, W*Cout)          conv2 bias tiled across W (f32)
    # out_ref: (NB, H, W*Cout)      f32 output
    # h_ref:   (NB*H, W*Cout)       compute_dtype staging buffer for ReLU(conv1)
    NB, H, WCin = x_ref.shape
    WCout = out_ref.shape[2]
    M = NB * H

    # Row masks for the height zero-padding (ky = 0 / ky = 2 halo rows),
    # hoisted so both convs reuse them.  Because batch is flattened into
    # M = NB*H the same masks also kill the cross-image wrap of the rolls.
    row = jax.lax.broadcasted_iota(jnp.int32, (M, WCout), 0) % H
    not_first_row = row != 0           # rows with a valid (i-1) contribution
    not_last_row = row != (H - 1)      # rows with a valid (i+1) contribution

    def conv3x3(act2d, m_ref, b_ref):
        # act2d: (M, K) in compute_dtype.  Returns conv + bias (pre-ReLU), f32.
        # Three MXU matmuls (one per kernel row ky); kx taps and width padding
        # are folded into the band matrices.  The ky = +/-1 row shift is done
        # in-register: XLU roll + mask, no sublane-unaligned VMEM RMWs.
        p1 = jnp.dot(act2d, m_ref[1], preferred_element_type=jnp.float32)
        p0 = jnp.dot(act2d, m_ref[0], preferred_element_type=jnp.float32)
        p2 = jnp.dot(act2d, m_ref[2], preferred_element_type=jnp.float32)
        # output row i needs p0 from row i-1 and p2 from row i+1
        p0s = jnp.where(not_first_row, pltpu.roll(p0, shift=1, axis=0), 0.0)
        p2s = jnp.where(not_last_row, pltpu.roll(p2, shift=M - 1, axis=0), 0.0)
        return p1 + b_ref[...] + p0s + p2s

    # ---- conv1 (3x3, stride 1, pad 1) + ReLU ----
    x2 = x_ref[...].reshape(M, WCin)
    h = jnp.maximum(conv3x3(x2, m1_ref, b1_ref), 0.0)
    # Stage through VMEM: bounds vreg liveness across conv2 and gives conv2 a
    # compute_dtype operand to read directly.
    h_ref[...] = h.astype(compute_dtype)

    # ---- conv2 (3x3, stride 1, pad 1) + ReLU ----
    y = jnp.maximum(conv3x3(h_ref[...], m2_ref, b2_ref), 0.0)
    out_ref[...] = y.reshape(NB, H, WCout).astype(out_ref.dtype)


def _conv3x3_band_matrices(w_oihw, W, dtype):
    """OIHW (Cout, Cin, 3, 3) conv weights -> (3, W*Cin, W*Cout) per-ky bands.

    band[ky, win*Cin + ci, w*Cout + co] = w_oihw[co, ci, ky, win - w + 1]
    whenever |win - w| <= 1, else 0.  kx taps and width padding (pad=1) are
    absorbed into the band structure.
    """
    Cout, Cin, KH, KW = w_oihw.shape
    wk = jnp.transpose(w_oihw, (2, 3, 1, 0)).astype(jnp.float32)  # (3,3,Cin,Cout)
    bands = []
    for ky in range(KH):
        m = jnp.zeros((W * Cin, W * Cout), jnp.float32)
        for kx in range(KW):
            # shift[win, w] == 1  iff  win == w + kx - 1
            shift = jnp.eye(W, W, k=1 - kx, dtype=jnp.float32)
            m = m + jnp.einsum("pq,io->piqo", shift, wk[ky, kx]).reshape(
                W * Cin, W * Cout)
        bands.append(m)
    return jnp.stack(bands).astype(dtype)                          # (3, W*Cin, W*Cout)


def _default_compute_dtype():
    """bf16 on bf16-native MXU generations (v6e / v7x), f32 elsewhere."""
    try:
        kind = jax.devices()[0].device_kind.lower()
    except Exception:
        return jnp.float32
    if any(tag in kind for tag in ("v6", "v7", "tpu7")):
        return jnp.bfloat16
    return jnp.float32


def _vmem_capacity_bytes():
    try:
        return int(pltpu.get_tpu_info().vmem_capacity_bytes)
    except Exception:
        return 64 * 1024 * 1024  # conservative (v7x per-TC VMEM)


def _pick_batch_block(N, H, step_bytes, vmem_budget):
    """Largest per-step batch chunk with M = bb*H >= 256 while still giving
    >= 2 grid steps (both v7x TensorCores busy); otherwise the whole batch in
    one step so the MXU M dimension is as large as possible.  Then shrink (to
    a divisor of N) if the per-step VMEM footprint exceeds the budget."""
    bb = N
    for steps in range(N, 1, -1):
        if N % steps == 0 and (N // steps) * H >= 256:
            bb = N // steps
            break
    while bb > 1 and step_bytes(bb) > vmem_budget:
        nb = bb - 1
        while N % nb:
            nb -= 1
        bb = nb
    return bb


def block_forward(x_nchw, w1_oihw, b1, w2_oihw, b2, *,
                  batch_block=None, compute_dtype=None):
    """Block forward: ReLU(conv2(ReLU(conv1(x)))), both convs 3x3/stride1/pad1.

    x_nchw: (N, Cin, H, W) float32.  Returns (N, Cout, H, W) float32.
    """
    N, Cin, H, W = x_nchw.shape
    Cout = w1_oihw.shape[0]
    if compute_dtype is None:
        compute_dtype = _default_compute_dtype()
    act_bytes = jnp.dtype(compute_dtype).itemsize

    wcin, wcout = W * Cin, W * Cout
    vmem_cap = _vmem_capacity_bytes()

    # Step-invariant weight footprint (double-buffered by default) + biases.
    weight_bytes = (2 * (3 * wcin * wcout + 3 * wcout * wcout) * act_bytes
                    + 2 * 2 * wcout * 4)

    def step_bytes(bb):
        return (2 * bb * H * wcin * act_bytes     # input tile (double-buffered)
                + 2 * bb * H * wcout * 4          # f32 output tile (double-buffered)
                + bb * H * wcout * act_bytes      # h staging scratch
                + weight_bytes)

    if batch_block is None:
        batch_block = _pick_batch_block(N, H, step_bytes, int(vmem_cap * 0.7))
    assert N % batch_block == 0, "batch must be divisible by batch_block"
    grid = (N // batch_block,)

    # Derive the scoped VMEM limit from the real footprint, capped below the
    # device's physical VMEM (64 MiB on v7x vs 128 MiB on v5e/v6e).
    vmem_limit = int(min(vmem_cap * 9 // 10,
                         max(32 * 1024 * 1024, 2 * step_bytes(batch_block))))

    # Glue: NCHW -> lane-folded (N, H, W*Cin); weights -> band matrices;
    # biases tiled across W so they broadcast over the folded lane axis.
    xf = jnp.transpose(x_nchw, (0, 2, 3, 1)).reshape(N, H, wcin)
    xf = xf.astype(compute_dtype)
    m1 = _conv3x3_band_matrices(w1_oihw, W, compute_dtype)          # (3, W*Cin,  W*Cout)
    m2 = _conv3x3_band_matrices(w2_oihw, W, compute_dtype)          # (3, W*Cout, W*Cout)
    b1t = jnp.tile(b1.astype(jnp.float32), W).reshape(1, wcout)
    b2t = jnp.tile(b2.astype(jnp.float32), W).reshape(1, wcout)

    kernel = functools.partial(_block_kernel, compute_dtype=compute_dtype)

    out = pl.pallas_call(
        kernel,
        out_shape=jax.ShapeDtypeStruct((N, H, wcout), jnp.float32),
        grid_spec=pltpu.PrefetchScalarGridSpec(
            num_scalar_prefetch=0,
            grid=grid,
            in_specs=[
                pl.BlockSpec((batch_block, H, wcin), lambda g: (g, 0, 0)),
                pl.BlockSpec((3, wcin, wcout), lambda g: (0, 0, 0)),
                pl.BlockSpec((1, wcout), lambda g: (0, 0)),
                pl.BlockSpec((3, wcout, wcout), lambda g: (0, 0, 0)),
                pl.BlockSpec((1, wcout), lambda g: (0, 0)),
            ],
            out_specs=pl.BlockSpec((batch_block, H, wcout),
                                   lambda g: (g, 0, 0)),
            scratch_shapes=[
                pltpu.VMEM((batch_block * H, wcout), compute_dtype),
            ],
        ),
        compiler_params=pltpu.CompilerParams(
            dimension_semantics=("parallel",),
            vmem_limit_bytes=vmem_limit),
    )(xf, m1, b1t, m2, b2t)

    # (N, H, W*Cout) -> (N, Cout, H, W)
    return jnp.transpose(out.reshape(N, H, W, Cout), (0, 3, 1, 2))


def _reference(x_nchw, w1, b1, w2, b2):
    dn = ("NCHW", "OIHW", "NCHW")
    h = jax.lax.conv_general_dilated(x_nchw, w1, (1, 1), [(1, 1), (1, 1)],
                                     dimension_numbers=dn)
    h = jnp.maximum(h + b1[None, :, None, None], 0.0)
    y = jax.lax.conv_general_dilated(h, w2, (1, 1), [(1, 1), (1, 1)],
                                     dimension_numbers=dn)
    return jnp.maximum(y + b2[None, :, None, None], 0.0)


if __name__ == "__main__":
    N, Cin, Cout, H, W = 2, 4, 8, 16, 16

    key = jax.random.PRNGKey(0)
    kx, k1, kb1, k2, kb2 = jax.random.split(key, 5)
    x = jax.random.normal(kx, (N, Cin, H, W), jnp.float32)
    # PyTorch Conv2d parameter shapes: OIHW weights, (O,) bias
    w1 = jax.random.normal(k1, (Cout, Cin, 3, 3), jnp.float32) * 0.1
    b1 = jax.random.normal(kb1, (Cout,), jnp.float32) * 0.1
    w2 = jax.random.normal(k2, (Cout, Cout, 3, 3), jnp.float32) * 0.1
    b2 = jax.random.normal(kb2, (Cout,), jnp.float32) * 0.1

    ref = _reference(x, w1, b1, w2, b2)

    # Exactness check on the f32 compute path.
    f32_fwd = jax.jit(functools.partial(block_forward,
                                        compute_dtype=jnp.float32))
    out32 = jax.block_until_ready(f32_fwd(x, w1, b1, w2, b2))
    np.testing.assert_allclose(np.asarray(out32), np.asarray(ref),
                               rtol=1e-4, atol=1e-4)

    # Default path: bf16 compute on v6e/v7x (f32 accumulation) -> looser
    # tolerance (expected bf16 input/weight quantization, not a bug).
    if _default_compute_dtype() != jnp.float32:
        out_def = jax.block_until_ready(
            jax.jit(block_forward)(x, w1, b1, w2, b2))
        np.testing.assert_allclose(np.asarray(out_def), np.asarray(ref),
                                   rtol=5e-2, atol=5e-2)

    print("KERNEL_OK")
</pallas_src>

<mosaic_0001>
module attributes {stable_mosaic.version = 11 : i64} {
  func.func @_block_kernel(%arg0: i32, %arg1: memref<2x16x64xf32, #tpu.memory_space<vmem>>, %arg2: memref<3x64x128xf32, #tpu.memory_space<vmem>>, %arg3: memref<1x128xf32, #tpu.memory_space<vmem>>, %arg4: memref<3x128x128xf32, #tpu.memory_space<vmem>>, %arg5: memref<1x128xf32, #tpu.memory_space<vmem>>, %arg6: memref<2x16x128xf32, #tpu.memory_space<vmem>>, %arg7: memref<32x128xf32, #tpu.memory_space<vmem>>) attributes {dimension_semantics = [#tpu.dimension_semantics<parallel>], iteration_bounds = array<i64: 1>, scalar_prefetch = 0 : i64, scratch_operands = 1 : i64, tpu.core_type = #tpu.core_type<tc>, window_params = [{transform_indices = @transform_0, window_bounds = array<i64: 2, 16, 64>}, {pipeline_mode = #tpu.pipeline_mode<synchronous>, transform_indices = @transform_1, window_bounds = array<i64: 3, 64, 128>}, {pipeline_mode = #tpu.pipeline_mode<synchronous>, transform_indices = @transform_2, window_bounds = array<i64: 1, 128>}, {pipeline_mode = #tpu.pipeline_mode<synchronous>, transform_indices = @transform_3, window_bounds = array<i64: 3, 128, 128>}, {pipeline_mode = #tpu.pipeline_mode<synchronous>, transform_indices = @transform_4, window_bounds = array<i64: 1, 128>}, {transform_indices = @transform_5, window_bounds = array<i64: 2, 16, 128>}]} {
    %0 = tpu.iota {dimensions = array<i32: 0>} : vector<32x128xi32>
    %c16_i32 = arith.constant 16 : i32
    %c0_i32 = arith.constant 0 : i32
    %1 = arith.cmpi eq, %c16_i32, %c0_i32 : i32
    %c1_i32 = arith.constant 1 : i32
    %2 = arith.select %1, %c1_i32, %c16_i32 : i32
    %3 = vector.broadcast %2 : i32 to vector<32x128xi32>
    %4 = arith.remsi %0, %3 : vector<32x128xi32>
    %c0_i32_0 = arith.constant 0 : i32
    %5 = vector.broadcast %c0_i32_0 : i32 to vector<32x128xi32>
    %6 = arith.cmpi ne, %4, %5 : vector<32x128xi32>
    %c0_i32_1 = arith.constant 0 : i32
    %7 = vector.broadcast %c0_i32_1 : i32 to vector<32x128xi32>
    %8 = arith.cmpi slt, %4, %7 : vector<32x128xi32>
    %c0_i32_2 = arith.constant 0 : i32
    %9 = arith.cmpi slt, %2, %c0_i32_2 : i32
    %10 = vector.broadcast %9 : i1 to vector<32x128xi1>
    %11 = vector.broadcast %10 : vector<32x128xi1> to vector<32x128xi1>
    %12 = arith.xori %8, %11 : vector<32x128xi1>
    %13 = arith.andi %12, %6 : vector<32x128xi1>
    %14 = vector.broadcast %2 : i32 to vector<32x128xi32>
    %15 = arith.addi %4, %14 : vector<32x128xi32>
    %16 = arith.select %13, %15, %4 : vector<32x128xi1>, vector<32x128xi32>
    %c0_i32_3 = arith.constant 0 : i32
    %17 = vector.broadcast %c0_i32_3 : i32 to vector<32x128xi32>
    %18 = arith.cmpi ne, %16, %17 : vector<32x128xi32>
    %c15_i32 = arith.constant 15 : i32
    %19 = vector.broadcast %c15_i32 : i32 to vector<32x128xi32>
    %20 = arith.cmpi ne, %16, %19 : vector<32x128xi32>
    %c0 = arith.constant 0 : index
    %c0_4 = arith.constant 0 : index
    %c0_5 = arith.constant 0 : index
    %21 = vector.load %arg1[%c0, %c0_4, %c0_5] : memref<2x16x64xf32, #tpu.memory_space<vmem>>, vector<2x16x64xf32>
    %22 = vector.shape_cast %21 : vector<2x16x64xf32> to vector<32x64xf32>
    %c1 = arith.constant 1 : index
    %c0_6 = arith.constant 0 : index
    %c0_7 = arith.constant 0 : index
    %23 = vector.load %arg2[%c1, %c0_6, %c0_7] : memref<3x64x128xf32, #tpu.memory_space<vmem>>, vector<1x64x128xf32>
    %24 = vector.shape_cast %23 : vector<1x64x128xf32> to vector<64x128xf32>
    %cst = arith.constant dense<0.000000e+00> : vector<32x128xf32>
    %25 = tpu.matmul %22, %24, %cst {dimension_numbers = #tpu.dot_dimension_numbers<[1], [0], [0], [1], [0, 0, 1, 1], [], []>} : vector<32x64xf32>, vector<64x128xf32>, vector<32x128xf32> -> vector<32x128xf32>
    %c0_8 = arith.constant 0 : index
    %c0_9 = arith.constant 0 : index
    %c0_10 = arith.constant 0 : index
    %26 = vector.load %arg2[%c0_8, %c0_9, %c0_10] : memref<3x64x128xf32, #tpu.memory_space<vmem>>, vector<1x64x128xf32>
    %27 = vector.shape_cast %26 : vector<1x64x128xf32> to vector<64x128xf32>
    %cst_11 = arith.constant dense<0.000000e+00> : vector<32x128xf32>
    %28 = tpu.matmul %22, %27, %cst_11 {dimension_numbers = #tpu.dot_dimension_numbers<[1], [0], [0], [1], [0, 0, 1, 1], [], []>} : vector<32x64xf32>, vector<64x128xf32>, vector<32x128xf32> -> vector<32x128xf32>
    %c2 = arith.constant 2 : index
    %c0_12 = arith.constant 0 : index
    %c0_13 = arith.constant 0 : index
    %29 = vector.load %arg2[%c2, %c0_12, %c0_13] : memref<3x64x128xf32, #tpu.memory_space<vmem>>, vector<1x64x128xf32>
    %30 = vector.shape_cast %29 : vector<1x64x128xf32> to vector<64x128xf32>
    %cst_14 = arith.constant dense<0.000000e+00> : vector<32x128xf32>
    %31 = tpu.matmul %22, %30, %cst_14 {dimension_numbers = #tpu.dot_dimension_numbers<[1], [0], [0], [1], [0, 0, 1, 1], [], []>} : vector<32x64xf32>, vector<64x128xf32>, vector<32x128xf32> -> vector<32x128xf32>
    %c1_i32_15 = arith.constant 1 : i32
    %32 = tpu.dynamic_rotate %28 by %c1_i32_15 dim 0 : vector<32x128xf32>, i32 -> vector<32x128xf32>
    %cst_16 = arith.constant 0.000000e+00 : f32
    %33 = vector.broadcast %cst_16 : f32 to vector<32x128xf32>
    %34 = arith.select %18, %32, %33 : vector<32x128xi1>, vector<32x128xf32>
    %c31_i32 = arith.constant 31 : i32
    %35 = tpu.dynamic_rotate %31 by %c31_i32 dim 0 : vector<32x128xf32>, i32 -> vector<32x128xf32>
    %cst_17 = arith.constant 0.000000e+00 : f32
    %36 = vector.broadcast %cst_17 : f32 to vector<32x128xf32>
    %37 = arith.select %20, %35, %36 : vector<32x128xi1>, vector<32x128xf32>
    %c0_18 = arith.constant 0 : index
    %c0_19 = arith.constant 0 : index
    %38 = vector.load %arg3[%c0_18, %c0_19] : memref<1x128xf32, #tpu.memory_space<vmem>>, vector<1x128xf32>
    %39 = vector.broadcast %38 : vector<1x128xf32> to vector<32x128xf32>
    %40 = arith.addf %25, %39 : vector<32x128xf32>
    %41 = arith.addf %40, %34 : vector<32x128xf32>
    %42 = arith.addf %41, %37 : vector<32x128xf32>
    %cst_20 = arith.constant 0.000000e+00 : f32
    %43 = vector.broadcast %cst_20 : f32 to vector<32x128xf32>
    %44 = arith.maximumf %42, %43 : vector<32x128xf32>
    %c0_21 = arith.constant 0 : index
    %c0_22 = arith.constant 0 : index
    %45 = vector.load %arg7[%c0_21, %c0_22] : memref<32x128xf32, #tpu.memory_space<vmem>>, vector<32x128xf32>
    tpu.vector_store %arg7[%c0_21, %c0_22], %44 {strides = array<i32>} : memref<32x128xf32, #tpu.memory_space<vmem>>, vector<32x128xf32>,
    %c0_23 = arith.constant 0 : index
    %c0_24 = arith.constant 0 : index
    %46 = vector.load %arg7[%c0_23, %c0_24] : memref<32x128xf32, #tpu.memory_space<vmem>>, vector<32x128xf32>
    %c1_25 = arith.constant 1 : index
    %c0_26 = arith.constant 0 : index
    %c0_27 = arith.constant 0 : index
    %47 = vector.load %arg4[%c1_25, %c0_26, %c0_27] : memref<3x128x128xf32, #tpu.memory_space<vmem>>, vector<1x128x128xf32>
    %48 = vector.shape_cast %47 : vector<1x128x128xf32> to vector<128x128xf32>
    %cst_28 = arith.constant dense<0.000000e+00> : vector<32x128xf32>
    %49 = tpu.matmul %46, %48, %cst_28 {dimension_numbers = #tpu.dot_dimension_numbers<[1], [0], [0], [1], [0, 0, 1, 1], [], []>} : vector<32x128xf32>, vector<128x128xf32>, vector<32x128xf32> -> vector<32x128xf32>
    %c0_29 = arith.constant 0 : index
    %c0_30 = arith.constant 0 : index
    %c0_31 = arith.constant 0 : index
    %50 = vector.load %arg4[%c0_29, %c0_30, %c0_31] : memref<3x128x128xf32, #tpu.memory_space<vmem>>, vector<1x128x128xf32>
    %51 = vector.shape_cast %50 : vector<1x128x128xf32> to vector<128x128xf32>
    %cst_32 = arith.constant dense<0.000000e+00> : vector<32x128xf32>
    %52 = tpu.matmul %46, %51, %cst_32 {dimension_numbers = #tpu.dot_dimension_numbers<[1], [0], [0], [1], [0, 0, 1, 1], [], []>} : vector<32x128xf32>, vector<128x128xf32>, vector<32x128xf32> -> vector<32x128xf32>
    %c2_33 = arith.constant 2 : index
    %c0_34 = arith.constant 0 : index
    %c0_35 = arith.constant 0 : index
    %53 = vector.load %arg4[%c2_33, %c0_34, %c0_35] : memref<3x128x128xf32, #tpu.memory_space<vmem>>, vector<1x128x128xf32>
    %54 = vector.shape_cast %53 : vector<1x128x128xf32> to vector<128x128xf32>
    %cst_36 = arith.constant dense<0.000000e+00> : vector<32x128xf32>
    %55 = tpu.matmul %46, %54, %cst_36 {dimension_numbers = #tpu.dot_dimension_numbers<[1], [0], [0], [1], [0, 0, 1, 1], [], []>} : vector<32x128xf32>, vector<128x128xf32>, vector<32x128xf32> -> vector<32x128xf32>
    %c1_i32_37 = arith.constant 1 : i32
    %56 = tpu.dynamic_rotate %52 by %c1_i32_37 dim 0 : vector<32x128xf32>, i32 -> vector<32x128xf32>
    %cst_38 = arith.constant 0.000000e+00 : f32
    %57 = vector.broadcast %cst_38 : f32 to vector<32x128xf32>
    %58 = arith.select %18, %56, %57 : vector<32x128xi1>, vector<32x128xf32>
    %c31_i32_39 = arith.constant 31 : i32
    %59 = tpu.dynamic_rotate %55 by %c31_i32_39 dim 0 : vector<32x128xf32>, i32 -> vector<32x128xf32>
    %cst_40 = arith.constant 0.000000e+00 : f32
    %60 = vector.broadcast %cst_40 : f32 to vector<32x128xf32>
    %61 = arith.select %20, %59, %60 : vector<32x128xi1>, vector<32x128xf32>
    %c0_41 = arith.constant 0 : index
    %c0_42 = arith.constant 0 : index
    %62 = vector.load %arg5[%c0_41, %c0_42] : memref<1x128xf32, #tpu.memory_space<vmem>>, vector<1x128xf32>
    %63 = vector.broadcast %62 : vector<1x128xf32> to vector<32x128xf32>
    %64 = arith.addf %49, %63 : vector<32x128xf32>
    %65 = arith.addf %64, %58 : vector<32x128xf32>
    %66 = arith.addf %65, %61 : vector<32x128xf32>
    %cst_43 = arith.constant 0.000000e+00 : f32
    %67 = vector.broadcast %cst_43 : f32 to vector<32x128xf32>
    %68 = arith.maximumf %66, %67 : vector<32x128xf32>
    %69 = vector.shape_cast %68 : vector<32x128xf32> to vector<2x16x128xf32>
    %c0_44 = arith.constant 0 : index
    %c0_45 = arith.constant 0 : index
    %c0_46 = arith.constant 0 : index
    %70 = vector.load %arg6[%c0_44, %c0_45, %c0_46] : memref<2x16x128xf32, #tpu.memory_space<vmem>>, vector<2x16x128xf32>
    tpu.vector_store %arg6[%c0_44, %c0_45, %c0_46], %69 {strides = array<i32>} : memref<2x16x128xf32, #tpu.memory_space<vmem>>, vector<2x16x128xf32>,
    return
  }
  func.func @transform_0(%arg0: i32) -> (i32, i32, i32) {
    %c0_i32 = arith.constant 0 : i32
    %c0_i32_0 = arith.constant 0 : i32
    %c0_i32_1 = arith.constant 0 : i32
    return %arg0, %c0_i32, %c0_i32_0 : i32, i32, i32
  }
  func.func @transform_1(%arg0: i32) -> (i32, i32, i32) {
    %c0_i32 = arith.constant 0 : i32
    %c0_i32_0 = arith.constant 0 : i32
    %c0_i32_1 = arith.constant 0 : i32
    %c0_i32_2 = arith.constant 0 : i32
    return %c0_i32, %c0_i32_0, %c0_i32_1 : i32, i32, i32
  }
  func.func @transform_2(%arg0: i32) -> (i32, i32) {
    %c0_i32 = arith.constant 0 : i32
    %c0_i32_0 = arith.constant 0 : i32
    %c0_i32_1 = arith.constant 0 : i32
    return %c0_i32, %c0_i32_0 : i32, i32
  }
  func.func @transform_3(%arg0: i32) -> (i32, i32, i32) {
    %c0_i32 = arith.constant 0 : i32
    %c0_i32_0 = arith.constant 0 : i32
    %c0_i32_1 = arith.constant 0 : i32
    %c0_i32_2 = arith.constant 0 : i32
    return %c0_i32, %c0_i32_0, %c0_i32_1 : i32, i32, i32
  }
  func.func @transform_4(%arg0: i32) -> (i32, i32) {
    %c0_i32 = arith.constant 0 : i32
    %c0_i32_0 = arith.constant 0 : i32
    %c0_i32_1 = arith.constant 0 : i32
    return %c0_i32, %c0_i32_0 : i32, i32
  }
  func.func @transform_5(%arg0: i32) -> (i32, i32, i32) {
    %c0_i32 = arith.constant 0 : i32
    %c0_i32_0 = arith.constant 0 : i32
    %c0_i32_1 = arith.constant 0 : i32
    return %arg0, %c0_i32, %c0_i32_0 : i32, i32, i32
  }
}

</mosaic_0001>

<bundles_post_ra>
// kernel: tile.13
= control target key start
LH: loop header
LB: loop body
LE: loop exit
PB: predicated region body
PF: predicated region fallthrough
CT: control target
= control target key end

     0   :  { %s28_s0 = inlined_call_operand.vmem [shape: f32[8], index: 0, kind: input, shape index: {}]   ;;  %s29_s1 = inlined_call_operand.vmem [shape: f32[16,8], index: 1, kind: output, shape index: {}]  }
   0x1   :  { %v4_v0 = vld [vmem:[%s28_s0] ss:$0 sm:$0xff] }
   0x2   :  { %5 = vst [vmem:[%s29_s1] sm:$0xff] %v4_v0  ;;  %8 = vst [vmem:[%s29_s1 + $0x8] sm:$0xff] %v4_v0 }

// kernel: tile.14
= control target key start
LH: loop header
LB: loop body
LE: loop exit
PB: predicated region body
PF: predicated region fallthrough
CT: control target
= control target key end

     0   :  { %s131_s10 = smov 120   ;;  %s132_s11 = smov 104   ;;  %vm3_vm0 = vcmask 64512   ;;  %vm9_vm1 = vcmask 1048512   ;;  %vm15_vm2 = vcmask 982912   ;;  %vm21_vm3 = vcmask 917312   ;;  %s207_s0 = inlined_call_operand.vmem [shape: f32[16,8], index: 0, kind: input, shape index: {}]   ;;  %s208_s1 = inlined_call_operand.vmem [shape: f32[1,128], index: 1, kind: output, shape index: {}]  }
   0x1   :  { %v101_v0 = vld [vmem:[%s207_s0 + $0xf] sm:$0x1]   ;;  %v103_v1 = vld [vmem:[%s207_s0 + $0xd] sm:$0x1]   ;;  %v102_v2 = vld [vmem:[%s207_s0 + $0xe] sm:$0x1]  }
   0x2   :  { %7 = vrot.lane.b32.xlu0 %v101_v0, %s131_s10  ;;  %19 = vrot.lane.b32.xlu1 %v103_v1, %s132_s11  ;;  %v104_v3 = vld [vmem:[%s207_s0 + $0xc] sm:$0x1]   ;;  %s133_s16 = smov 112   ;;  %s134_s17 = smov 96   ;;  %v105_v4 = vld [vmem:[%s207_s0 + $0xb] sm:$0x1]  }
   0x3   :  { %v106_v5 = vld [vmem:[%s207_s0 + $0xa] sm:$0x1]   ;;  %v2_v6 = vld [vmem:[%s207_s0] sm:$0x1]   ;;  %s135_s24 = smov 88   ;;  %s136_s25 = smov 80  }
   0x4   :  { %4 = vst.msk [vmem:[#allocation0] sm:$0x1] %vm3_vm0, %v2_v6   ;;  %v107_v7 = vld [vmem:[%s207_s0 + $0x9] sm:$0x1]   ;;  %v108_v8 = vld [vmem:[%s207_s0 + $0x8] sm:$0x1]  }
   0x5   :  { %s137_s30 = smov 72   ;;  %s138_s2 = smov 64   ;;  %v109_v9 = vld [vmem:[%s207_s0 + $0x7] sm:$0x1]   ;;  %v110_v10 = vld [vmem:[%s207_s0 + $0x6] sm:$0x1]  }
   0x6   :  { %13 = vrot.lane.b32.xlu0 %v102_v2, %s133_s16  ;;  %25 = vrot.lane.b32.xlu1 %v104_v3, %s134_s17  ;;  %s139_s7 = smov 56   ;;  %s140_s8 = smov 48   ;;  %v111_v11 = vld [vmem:[%s207_s0 + $0x5] sm:$0x1]   ;;  %v112_v12 = vld [vmem:[%s207_s0 + $0x4] sm:$0x1]  }
   0x7   :  { %s141_s13 = smov 40   ;;  %s142_s14 = smov 32   ;;  %v113_v13 = vld [vmem:[%s207_s0 + $0x3] sm:$0x1]   ;;  %v114_v14 = vld [vmem:[%s207_s0 + $0x2] sm:$0x1]  }
   0x8   :  { %s143_s19 = smov 24   ;;  %s144_s20 = smov 16   ;;  %v115_v15 = vld [vmem:[%s207_s0 + $0x1] sm:$0x1]   ;;  %vm27_vm4 = vcmask 851712   ;;  %vm33_vm5 = vcmask 786112  }
   0x9   :  { %s145_s0 = smov 8   ;;  %vm39_vm6 = vcmask 720512   ;;  %vm45_vm7 = vcmask 654912   ;;  %vm51_vm8 = vcmask 589312   ;;  %vm57_vm9 = vcmask 523712  }
   0xa   :  { %31 = vrot.lane.b32.xlu0 %v105_v4, %s135_s24  ;;  %37 = vrot.lane.b32.xlu1 %v106_v5, %s136_s25  ;;  %vm63_vm10 = vcmask 458112   ;;  %vm69_vm11 = vcmask 392512   ;;  %vm75_vm12 = vcmask 326912   ;;  %vm81_vm13 = vcmask 261312  }
   0xb   :  { %vm87_vm14 = vcmask 195712   ;;  %vm93_vm15 = vcmask 130112  }
   0xe   :  { %43 = vrot.lane.b32.xlu0 %v107_v7, %s137_s30  ;;  %49 = vrot.lane.b32.xlu1 %v108_v8, %s138_s2 }
  0x12   :  { %55 = vrot.lane.b32.xlu0 %v109_v9, %s139_s7  ;;  %61 = vrot.lane.b32.xlu1 %v110_v10, %s140_s8 }
  0x16   :  { %67 = vrot.lane.b32.xlu0 %v111_v11, %s141_s13  ;;  %73 = vrot.lane.b32.xlu1 %v112_v12, %s142_s14 }
  0x1a   :  { %79 = vrot.lane.b32.xlu0 %v113_v13, %s143_s19  ;;  %85 = vrot.lane.b32.xlu1 %v114_v14, %s144_s20 }
  0x1e   :  { %91 = vrot.lane.b32.xlu0 %v115_v15, %s145_s0 }
  0x74   :  { %v8_v16 = vpop.permute.xlu0 %7   ;;  %v20_v17 = vpop.permute.xlu1 %19  }
  0x75   :  { %10 = vst.msk [vmem:[#allocation0] sm:$0x1] %vm9_vm1, %v8_v16  }
  0x78   :  { %v14_v18 = vpop.permute.xlu0 %13   ;;  %v26_v19 = vpop.permute.xlu1 %25  }
  0x79   :  { %16 = vst.msk [vmem:[#allocation0] sm:$0x1] %vm15_vm2, %v14_v18  }
  0x7a   :  { %22 = vst.msk [vmem:[#allocation0] sm:$0x1] %vm21_vm3, %v20_v17  }
  0x7b   :  { %28 = vst.msk [vmem:[#allocation0] sm:$0x1] %vm27_vm4, %v26_v19  }
  0x7c   :  { %v32_v20 = vpop.permute.xlu0 %31   ;;  %v38_v21 = vpop.permute.xlu1 %37  }
  0x7d   :  { %34 = vst.msk [vmem:[#allocation0] sm:$0x1] %vm33_vm5, %v32_v20  }
  0x7e   :  { %40 = vst.msk [vmem:[#allocation0] sm:$0x1] %vm39_vm6, %v38_v21  }
  0x80   :  { %v44_v22 = vpop.permute.xlu0 %43   ;;  %v50_v23 = vpop.permute.xlu1 %49  }
  0x81   :  { %46 = vst.msk [vmem:[#allocation0] sm:$0x1] %vm45_vm7, %v44_v22  }
  0x82   :  { %52 = vst.msk [vmem:[#allocation0] sm:$0x1] %vm51_vm8, %v50_v23  }
  0x84   :  { %v56_v24 = vpop.permute.xlu0 %55   ;;  %v62_v25 = vpop.permute.xlu1 %61  }
  0x85   :  { %58 = vst.msk [vmem:[#allocation0] sm:$0x1] %vm57_vm9, %v56_v24  }
  0x86   :  { %64 = vst.msk [vmem:[#allocation0] sm:$0x1] %vm63_vm10, %v62_v25  }
  0x88   :  { %v68_v26 = vpop.permute.xlu0 %67   ;;  %v74_v27 = vpop.permute.xlu1 %73  }
  0x89   :  { %70 = vst.msk [vmem:[#allocation0] sm:$0x1] %vm69_vm11, %v68_v26  }
  0x8a   :  { %76 = vst.msk [vmem:[#allocation0] sm:$0x1] %vm75_vm12, %v74_v27  }
  0x8c   :  { %v80_v28 = vpop.permute.xlu0 %79   ;;  %v86_v29 = vpop.permute.xlu1 %85  }
  0x8d   :  { %82 = vst.msk [vmem:[#allocation0] sm:$0x1] %vm81_vm13, %v80_v28  }
  0x8e   :  { %88 = vst.msk [vmem:[#allocation0] sm:$0x1] %vm87_vm14, %v86_v29  }
  0x90   :  { %v92_v30 = vpop.permute.xlu0 %91  }
  0x91   :  { %94 = vst.msk [vmem:[#allocation0] sm:$0x1] %vm93_vm15, %v92_v30  }
  0x98   :  { %v98_v31 = vld [vmem:[#allocation0] sm:$0x1] }
  0x99   :  { %100 = vst [vmem:[%s208_s1] sm:$0x1] %v98_v31 }

// kernel: block_forward.1
= control target key start
LH: loop header
LB: loop body
LE: loop exit
PB: predicated region body
PF: predicated region fallthrough
CT: control target
= control target key end

     0   :  { %vm102_vm0 = vcmask 523264   ;;  %s1634_s1 = inlined_call_operand.vmem [shape: f32[3,64,128], index: 1, kind: input, shape index: {}]   ;;  %s1635_s0 = inlined_call_operand.vmem [shape: f32[2,16,64], index: 0, kind: input, shape index: {}]   ;;  %s1636_s3 = inlined_call_operand.vmem [shape: f32[3,128,128], index: 3, kind: input, shape index: {}]   ;;  %s1637_s2 = inlined_call_operand.vmem [shape: f32[1,128], index: 2, kind: input, shape index: {}]   ;;  %s1638_s4 = inlined_call_operand.vmem [shape: f32[1,128], index: 4, kind: input, shape index: {}]   ;;  %s1639_s5 = inlined_call_operand.vmem [shape: f32[2,16,128], index: 5, kind: output, shape index: {}]  }
   0x1   :  { %v94_v0 = vld [vmem:[%s1634_s1] sm:$0xff]  ;;  %v95_v1 = vld [vmem:[%s1634_s1 + $0x8] sm:$0xff]  ;;  %v96_v2 = vld [vmem:[%s1634_s1 + $0x10] sm:$0xff] }
   0x2   :  { %v1126_v3 = vpack.c.bf16 %v95_v1, %v94_v0  ;;  %v97_v4 = vld [vmem:[%s1634_s1 + $0x18] sm:$0xff]  ;;  %v98_v5 = vld [vmem:[%s1634_s1 + $0x20] sm:$0xff]  ;;  %v99_v7 = vld [vmem:[%s1634_s1 + $0x28] sm:$0xff] }
   0x3   :  { %v1130_v6 = vpack.c.bf16 %v97_v4, %v96_v2  ;;  %v800_v8 = vld [vmem:[%s1634_s1 + $0x80] sm:$0xff]  ;;  %v801_v9 = vld [vmem:[%s1634_s1 + $0x88] sm:$0xff]  ;;  %v802_v11 = vld [vmem:[%s1634_s1 + $0x90] sm:$0xff]  ;;  %v1134_v16 = vpack.c.bf16 %v99_v7, %v98_v5 }
   0x4   :  { %1127 = vmatprep.subr.bf16.mxu0 %v1126_v3  ;;  %v1142_v10 = vpack.c.bf16 %v801_v9, %v800_v8  ;;  %v803_v12 = vld [vmem:[%s1634_s1 + $0x98] sm:$0xff]  ;;  %v81_v14 = vld [vmem:[%s1635_s0] sm:$0xff]  ;;  %v805_v17 = vld [vmem:[%s1634_s1 + $0xa8] sm:$0xff] }
   0x5   :  { %1129 = vmatpush3.bf16.msra.mxu0 %v1126_v3  ;;  %v1146_v13 = vpack.c.bf16 %v803_v12, %v802_v11  ;;  %v804_v15 = vld [vmem:[%s1634_s1 + $0xa0] sm:$0xff]  ;;  %v100_v18 = vld [vmem:[%s1634_s1 + $0x30] sm:$0xff]  ;;  %v101_v19 = vld [vmem:[%s1634_s1 + $0x38] sm:$0xff]  ;;  %962 = vmatprep.mubr.msk.f32.mxu0 %vm102_vm0, %v81_v14 }
   0x6   :  { %1131 = vmatprep.subr.bf16.mxu0 %v1130_v6  ;;  %1143 = vmatprep.subr.bf16.mxu1 %v1142_v10  ;;  %v1150_v20 = vpack.c.bf16 %v805_v17, %v804_v15  ;;  %v806_v21 = vld [vmem:[%s1634_s1 + $0xb0] sm:$0xff]  ;;  %v807_v22 = vld [vmem:[%s1634_s1 + $0xb8] sm:$0xff]  ;;  %v1138_v23 = vpack.c.bf16 %v101_v19, %v100_v18  ;;  %v788_v24 = vld [vmem:[%s1634_s1 + $0x40] sm:$0xff] }
   0x7   :  { %1145 = vmatpush3.bf16.msra.mxu1 %v1142_v10  ;;  %984 = vmatprep.mubr.msk.f32.mxu1 %vm102_vm0, %v81_v14  ;;  %v789_v25 = vld [vmem:[%s1634_s1 + $0x48] sm:$0xff]  ;;  %v1154_v26 = vpack.c.bf16 %v807_v22, %v806_v21  ;;  %v449_v27 = vld [vmem:[%s1636_s3] sm:$0xff]  ;;  %v790_v30 = vld [vmem:[%s1634_s1 + $0x50] sm:$0xff] }
   0x8   :  { %1147 = vmatprep.subr.bf16.mxu1 %v1146_v13  ;;  %v450_v28 = vld [vmem:[%s1636_s3 + $0x8] sm:$0xff]  ;;  %v1158_v29 = vpack.c.bf16 %v789_v25, %v788_v24  ;;  %v791_v31 = vld [vmem:[%s1634_s1 + $0x58] sm:$0xff]  ;;  %v451_v34 = vld [vmem:[%s1636_s3 + $0x10] sm:$0xff] }
   0x9   :  { %1133 = vmatpush3.bf16.msra.mxu0 %v1130_v6  ;;  %v1174_v32 = vpack.c.bf16 %v450_v28, %v449_v27  ;;  %v82_v33 = vld [vmem:[%s1635_s0 + $0x8] sm:$0xff]  ;;  %v452_v35 = vld [vmem:[%s1636_s3 + $0x18] sm:$0xff]  ;;  %v83_v36 = vld [vmem:[%s1635_s0 + $0x10] sm:$0xff]  ;;  %v1162_v37 = vpack.c.bf16 %v791_v31, %v790_v30  ;;  %v20_v27 = vlaneseq }
   0xa   :  { %1135 = vmatprep.subr.bf16.mxu0 %v1134_v16  ;;  %v792_v38 = vld [vmem:[%s1634_s1 + $0x60] sm:$0xff]  ;;  %v793_v39 = vld [vmem:[%s1634_s1 + $0x68] sm:$0xff]  ;;  %v1178_v40 = vpack.c.bf16 %v452_v35, %v451_v34  ;;  %v84_v41 = vld [vmem:[%s1635_s0 + $0x18] sm:$0xff] }
   0xb   :  { %1149 = vmatpush3.bf16.msra.mxu1 %v1146_v13  ;;  %v1166_v42 = vpack.c.bf16 %v793_v39, %v792_v38  ;;  %v794_v43 = vld [vmem:[%s1634_s1 + $0x70] sm:$0xff]  ;;  %v795_v44 = vld [vmem:[%s1634_s1 + $0x78] sm:$0xff]  ;;  %v833_v46 = vld [vmem:[%s1636_s3 + $0x100] sm:$0xff]  ;;  %v1501_v28 = vshrl.u32 %v20_v27, 7 }
   0xc   :  { %1151 = vmatprep.subr.bf16.mxu1 %v1150_v20  ;;  %v1170_v45 = vpack.c.bf16 %v795_v44, %v794_v43  ;;  %v834_v47 = vld [vmem:[%s1636_s3 + $0x108] sm:$0xff]  ;;  %v835_v49 = vld [vmem:[%s1636_s3 + $0x110] sm:$0xff]  ;;  %v836_v50 = vld [vmem:[%s1636_s3 + $0x118] sm:$0xff] }
   0xd   :  { %1137 = vmatpush3.bf16.msra.mxu0 %v1134_v16  ;;  %v1206_v48 = vpack.c.bf16 %v834_v47, %v833_v46  ;;  %v1210_v51 = vpack.c.bf16 %v836_v50, %v835_v49  ;;  %v453_v52 = vld [vmem:[%s1636_s3 + $0x20] sm:$0xff]  ;;  %v454_v53 = vld [vmem:[%s1636_s3 + $0x28] sm:$0xff]  ;;  %v455_v58 = vld [vmem:[%s1636_s3 + $0x30] sm:$0xff]  ;;  %vm298_vm1 = vcmp.lt.s32.totalorder %v1501_v28, 1  ;;  %vm311_vm2 = vcmp.lt.s32.totalorder %v1501_v28, 7 }
   0xe   :  { %1139 = vmatprep.subr.bf16.mxu0 %v1138_v23  ;;  %v1182_v54 = vpack.c.bf16 %v454_v53, %v453_v52  ;;  %v837_v55 = vld [vmem:[%s1636_s3 + $0x120] sm:$0xff]  ;;  %v838_v56 = vld [vmem:[%s1636_s3 + $0x128] sm:$0xff]  ;;  %v456_v59 = vld [vmem:[%s1636_s3 + $0x38] sm:$0xff] }
   0xf   :  { %1153 = vmatpush3.bf16.msra.mxu1 %v1150_v20  ;;  %v1214_v57 = vpack.c.bf16 %v838_v56, %v837_v55  ;;  %v1186_v60 = vpack.c.bf16 %v456_v59, %v455_v58  ;;  %v839_v61 = vld [vmem:[%s1636_s3 + $0x130] sm:$0xff]  ;;  %v840_v62 = vld [vmem:[%s1636_s3 + $0x138] sm:$0xff]  ;;  %v457_v0 = vld [vmem:[%s1636_s3 + $0x40] sm:$0xff]  ;;  %v23_v55 = vadd.s32 16, %v1501_v28 }
  0x10   :  { %1155 = vmatprep.subr.bf16.mxu1 %v1154_v26  ;;  %v1218_v63 = vpack.c.bf16 %v840_v62, %v839_v61  ;;  %v458_v1 = vld [vmem:[%s1636_s3 + $0x48] sm:$0xff]  ;;  %v841_v2 = vld [vmem:[%s1636_s3 + $0x140] sm:$0xff]  ;;  %v459_v6 = vld [vmem:[%s1636_s3 + $0x50] sm:$0xff] }
  0x11   :  { %1141 = vmatpush3.bf16.msra.mxu0 %v1138_v23  ;;  %v1190_v3 = vpack.c.bf16 %v458_v1, %v457_v0  ;;  %v842_v4 = vld [vmem:[%s1636_s3 + $0x148] sm:$0xff]  ;;  %v460_v7 = vld [vmem:[%s1636_s3 + $0x58] sm:$0xff]  ;;  %v843_v8 = vld [vmem:[%s1636_s3 + $0x150] sm:$0xff]  ;;  %v43_v61 = vand.u32 15, %v23_v55 }
  0x12   :  { %1159 = vmatprep.subr.bf16.mxu0 %v1158_v29  ;;  %v1222_v5 = vpack.c.bf16 %v842_v4, %v841_v2  ;;  %v1194_v9 = vpack.c.bf16 %v460_v7, %v459_v6  ;;  %v844_v10 = vld [vmem:[%s1636_s3 + $0x158] sm:$0xff]  ;;  %v461_v12 = vld [vmem:[%s1636_s3 + $0x60] sm:$0xff]  ;;  %v462_v13 = vld [vmem:[%s1636_s3 + $0x68] sm:$0xff] }
  0x13   :  { %1157 = vmatpush3.bf16.msra.mxu1 %v1154_v26  ;;  %v1226_v11 = vpack.c.bf16 %v844_v10, %v843_v8  ;;  %v845_v15 = vld [vmem:[%s1636_s3 + $0x160] sm:$0xff]  ;;  %v846_v16 = vld [vmem:[%s1636_s3 + $0x168] sm:$0xff]  ;;  %v463_v18 = vld [vmem:[%s1636_s3 + $0x70] sm:$0xff]  ;;  %vm1540_vm5 = vcmp.ne.s32.totalorder %v43_v61, 0 }
  0x14   :  { %963 = vmatmul.mubr.msk.f32.vlgmr.msra.gmra.mrb[0].mxu0 %vm102_vm0, %v82_v33  ;;  %1175 = vmatprep.subr.bf16.mxu1 %v1174_v32  ;;  %v1230_v17 = vpack.c.bf16 %v846_v16, %v845_v15  ;;  %v464_v19 = vld [vmem:[%s1636_s3 + $0x78] sm:$0xff]  ;;  %v847_v21 = vld [vmem:[%s1636_s3 + $0x170] sm:$0xff]  ;;  %v817_v24 = vld [vmem:[%s1636_s3 + $0x80] sm:$0xff] }
  0x15   :  { %1161 = vmatpush3.bf16.msra.mxu0 %v1158_v29  ;;  %965 = vmatprep.mubr.msk.f32.mxu0 %vm102_vm0, %v83_v36  ;;  %v1202_v20 = vpack.c.bf16 %v464_v19, %v463_v18  ;;  %v848_v22 = vld [vmem:[%s1636_s3 + $0x178] sm:$0xff]  ;;  %v818_v25 = vld [vmem:[%s1636_s3 + $0x88] sm:$0xff]  ;;  %v812_v58 = vld [vmem:[%s1637_s2] ss:$0 sm:$0xff] }
  0x16   :  { %1163 = vmatprep.subr.bf16.mxu0 %v1162_v37  ;;  %985 = vmatmul.mubr.msk.f32.vlgmr.msra.gmra.mrb[0].mxu1 %vm102_vm0, %v82_v33  ;;  %v1234_v23 = vpack.c.bf16 %v848_v22, %v847_v21  ;;  %v1498_v26 = vpack.c.bf16 %v818_v25, %v817_v24  ;;  %v819_v15 = vld [vmem:[%s1636_s3 + $0x90] sm:$0xff]  ;;  %v820_v16 = vld [vmem:[%s1636_s3 + $0x98] sm:$0xff]  ;;  %v821_v27 = vld [vmem:[%s1636_s3 + $0xa0] sm:$0xff] }
  0x17   :  { %987 = vmatprep.mubr.msk.f32.mxu1 %vm102_vm0, %v83_v36  ;;  %1177 = vmatpush3.bf16.msra.mxu1 %v1174_v32 }
  0x18   :  { %966 = vmatmul.mubr.msk.f32.gmra.mrb[2].mxu0 %vm102_vm0, %v84_v41  ;;  %1179 = vmatprep.subr.bf16.mxu1 %v1178_v40 }
  0x19   :  { %1165 = vmatpush3.bf16.msra.mxu0 %v1162_v37  ;;  %1006 = vmatprep.mubr.msk.f32.mxu0 %vm102_vm0, %v81_v14  ;;  %v1198_v14 = vpack.c.bf16 %v462_v13, %v461_v12 }
  0x1a   :  { %1167 = vmatprep.subr.bf16.mxu0 %v1166_v42  ;;  %988 = vmatmul.mubr.msk.f32.gmra.mrb[2].mxu1 %vm102_vm0, %v84_v41 }
  0x1b   :  { %1181 = vmatpush3.bf16.msra.mxu1 %v1178_v40 }
  0x1c   :  { %1183 = vmatprep.subr.bf16.mxu1 %v1182_v54 }
  0x1d   :  { %1169 = vmatpush3.bf16.msra.mxu0 %v1166_v42 }
  0x1e   :  { %1171 = vmatprep.subr.bf16.mxu0 %v1170_v45 }
  0x1f   :  { %1185 = vmatpush3.bf16.msra.mxu1 %v1182_v54  ;;  %v29_v54 = vand.u32 15, %v1501_v28 }
  0x20   :  { %1187 = vmatprep.subr.bf16.mxu1 %v1186_v60 }
  0x21   :  { %1173 = vmatpush3.bf16.msra.mxu0 %v1170_v45  ;;  %vm1528_vm3 = vcmp.ne.s32.totalorder %v29_v54, 0 }
  0x22   :  { %1207 = vmatprep.subr.bf16.mxu0 %v1206_v48 }
  0x23   :  { %1189 = vmatpush3.bf16.msra.mxu1 %v1186_v60 }
  0x24   :  { %1007 = vmatmul.mubr.msk.f32.vlgmr.msra.gmra.mrb[4].mxu0 %vm102_vm0, %v82_v33  ;;  %1191 = vmatprep.subr.bf16.mxu1 %v1190_v3 }
  0x25   :  { %1009 = vmatprep.mubr.msk.f32.mxu0 %vm102_vm0, %v83_v36  ;;  %1209 = vmatpush3.bf16.msra.mxu0 %v1206_v48 }
  0x26   :  { %1211 = vmatprep.subr.bf16.mxu0 %v1210_v51 }
  0x27   :  { %1193 = vmatpush3.bf16.msra.mxu1 %v1190_v3 }
  0x28   :  { %1010 = vmatmul.mubr.msk.f32.gmra.mrb[6].mxu0 %vm102_vm0, %v84_v41  ;;  %1195 = vmatprep.subr.bf16.mxu1 %v1194_v9 }
  0x29   :  { %1213 = vmatpush3.bf16.msra.mxu0 %v1210_v51  ;;  %v22_v51 = vadd.s32 8, %v1501_v28 }
  0x2a   :  { %1215 = vmatprep.subr.bf16.mxu0 %v1214_v57 }
  0x2b   :  { %1197 = vmatpush3.bf16.msra.mxu1 %v1194_v9  ;;  %v36_v56 = vand.u32 15, %v22_v51 }
  0x2c   :  { %1199 = vmatprep.subr.bf16.mxu1 %v1198_v14 }
  0x2d   :  { %1217 = vmatpush3.bf16.msra.mxu0 %v1214_v57  ;;  %v24_v57 = vadd.s32 24, %v1501_v28  ;;  %vm1532_vm4 = vcmp.ne.s32.totalorder %v36_v56, 15 }
  0x2e   :  { %1219 = vmatprep.subr.bf16.mxu0 %v1218_v63 }
  0x2f   :  { %1201 = vmatpush3.bf16.msra.mxu1 %v1198_v14  ;;  %v50_v1 = vand.u32 15, %v24_v57 }
  0x30   :  { %1203 = vmatprep.subr.bf16.mxu1 %v1202_v20 }
  0x31   :  { %1221 = vmatpush3.bf16.msra.mxu0 %v1218_v63  ;;  %vm1544_vm6 = vcmp.ne.s32.totalorder %v50_v1, 15 }
  0x32   :  { %1223 = vmatprep.subr.bf16.mxu0 %v1222_v5 }
  0x33   :  { %1205 = vmatpush3.bf16.msra.mxu1 %v1202_v20 }
  0x34   :  { %1239 = vmatprep.subr.bf16.mxu1 %v1498_v26 }
  0x35   :  { %1225 = vmatpush3.bf16.msra.mxu0 %v1222_v5 }
  0x36   :  { %1227 = vmatprep.subr.bf16.mxu0 %v1226_v11 }
  0x39   :  { %1229 = vmatpush3.bf16.msra.mxu0 %v1226_v11 }
  0x3a   :  { %1231 = vmatprep.subr.bf16.mxu0 %v1230_v17 }
  0x3d   :  { %1233 = vmatpush3.bf16.msra.mxu0 %v1230_v17 }
  0x3e   :  { %1235 = vmatprep.subr.bf16.mxu0 %v1234_v23 }
  0x41   :  { %1237 = vmatpush3.bf16.msra.mxu0 %v1234_v23  ;;  %v1242_v23 = vpack.c.bf16 %v820_v16, %v819_v15 }
  0xe7   :  { %v964_v29 = vpop.f32.mrb[0].mxu0 }
  0xe8   :  { %v295_v30 = vrot.slane %v964_v29, 7  ;;  %v181_v31 = vpop.f32.mrb[1].mxu0  ;;  %v822_v29 = vld [vmem:[%s1636_s3 + $0xa8] sm:$0xff] }
  0xe9   :  { %v294_v32 = vrot.slane %v181_v31, 7  ;;  %v986_v33 = vpop.f32.mrb[0].mxu1 }
  0xea   :  { %v308_v34 = vrot.slane %v986_v33, 1  ;;  %v275_v35 = vpop.f32.mrb[1].mxu1  ;;  %v823_v33 = vld [vmem:[%s1636_s3 + $0xb0] sm:$0xff] }
  0xeb   :  { %v967_v36 = vpop.f32.mrb[2].mxu0  ;;  %v307_v37 = vrot.slane %v275_v35, 1  ;;  %v301_v38 = vsel %vm298_vm1, %v294_v32, %v295_v30  ;;  %v825_v35 = vld [vmem:[%s1636_s3 + $0xc0] sm:$0xff] }
  0xec   :  { %v297_v39 = vrot.slane %v967_v36, 7  ;;  %v191_v40 = vpop.f32.mrb[3].mxu0  ;;  %v826_v36 = vld [vmem:[%s1636_s3 + $0xc8] sm:$0xff] }
  0xed   :  { %v296_v41 = vrot.slane %v191_v40, 7  ;;  %v314_v42 = vsel %vm311_vm2, %v307_v37, %v308_v34  ;;  %v989_v43 = vpop.f32.mrb[2].mxu1 }
  0xee   :  { %v310_v44 = vrot.slane %v989_v43, 1  ;;  %v285_v45 = vpop.f32.mrb[3].mxu1  ;;  %v302_v46 = vsel %vm298_vm1, %v297_v39, %v294_v32  ;;  %v1246_v32 = vpack.c.bf16 %v822_v29, %v821_v27 }
  0xef   :  { %v309_v47 = vrot.slane %v285_v45, 1  ;;  %v299_v48 = vsel %vm298_vm1, %v296_v41, %v297_v39  ;;  %v300_v49 = vsel %vm298_vm1, %v295_v30, %v296_v41  ;;  %v303_v4 = vsel %vm1528_vm3, %v302_v46, 0.0  ;;  %v828_v39 = vld [vmem:[%s1636_s3 + $0xd8] sm:$0xff]  ;;  %v829_v41 = vld [vmem:[%s1636_s3 + $0xe0] sm:$0xff] }
  0xf0   :  { %v315_v50 = vsel %vm311_vm2, %v310_v44, %v307_v37  ;;  %v305_v18 = vsel %vm1540_vm5, %v300_v49, 0.0  ;;  %v1254_v37 = vpack.c.bf16 %v826_v36, %v825_v35  ;;  %v832_v45 = vld [vmem:[%s1636_s3 + $0xf8] sm:$0xff] }
  0xf1   :  { %v312_v52 = vsel %vm311_vm2, %v309_v47, %v310_v44  ;;  %v313_v53 = vsel %vm311_vm2, %v308_v34, %v309_v47  ;;  %v319_v21 = vsel %vm1544_vm6, %v315_v50, 0.0  ;;  %v824_v34 = vld [vmem:[%s1636_s3 + $0xb8] sm:$0xff]  ;;  %v831_v44 = vld [vmem:[%s1636_s3 + $0xf0] sm:$0xff] }
  0xf2   :  { %v317_v5 = vsel %vm1532_vm4, %v313_v53, 0.0  ;;  %v1266_v46 = vpack.c.bf16 %v832_v45, %v831_v44 }
  0xf7   :  { %v1008_v59 = vpop.f32.mrb[4].mxu0 }
  0xf8   :  { %v399_v63 = vadd.f32 %v1008_v59, %v812_v58  ;;  %v393_v0 = vpop.f32.mrb[5].mxu0 }
  0xf9   :  { %v394_v2 = vadd.f32 %v812_v58, %v393_v0 }
  0xfa   :  { %v413_v3 = vadd.f32 %v399_v63, %v301_v38  ;;  %v827_v38 = vld [vmem:[%s1636_s3 + $0xd0] sm:$0xff] }
  0xfb   :  { %v412_v6 = vadd.f32 %v394_v2, %v303_v4  ;;  %v1011_v7 = vpop.f32.mrb[6].mxu0  ;;  %v1258_v40 = vpack.c.bf16 %v828_v39, %v827_v38 }
  0xfc   :  { %v417_v9 = vadd.f32 %v413_v3, %v317_v5  ;;  %v409_v10 = vadd.f32 %v1011_v7, %v812_v58  ;;  %v403_v11 = vpop.f32.mrb[7].mxu0 }
  0xfd   :  { %v404_v13 = vadd.f32 %v812_v58, %v403_v11  ;;  %v416_v14 = vadd.f32 %v412_v6, %v314_v42  ;;  %v830_v42 = vld [vmem:[%s1636_s3 + $0xe8] sm:$0xff] }
  0xfe   :  { %v415_v17 = vadd.f32 %v409_v10, %v299_v48  ;;  %v421_v22 = vmax.f32 %v417_v9, 0.0  ;;  %v1262_v43 = vpack.c.bf16 %v830_v42, %v829_v41  ;;  %v849_v10 = vld [vmem:[%s1638_s4] ss:$0 sm:$0xff] }
  0xff   :  { %v414_v19 = vadd.f32 %v404_v13, %v305_v18  ;;  %v420_v20 = vmax.f32 %v416_v14, 0.0 }
 0x100   :  { %v419_v24 = vadd.f32 %v415_v17, %v319_v21 }
 0x101   :  { %1044 = vmatprep.mubr.f32.mxu1 %v420_v20  ;;  %1082 = vmatprep.mubr.f32.mxu0 %v420_v20  ;;  %v418_v25 = vadd.f32 %v414_v19, %v312_v52 }
 0x102   :  { %1045 = vmatmul.mubr.f32.vlgmr.msra.gmra.mrb[4].mxu1 %v421_v22  ;;  %1083 = vmatmul.mubr.f32.vlgmr.msra.gmra.mrb[8].mxu0 %v421_v22  ;;  %v423_v31 = vmax.f32 %v419_v24, 0.0 }
 0x103   :  { %1241 = vmatpush3.bf16.msra.mxu1 %v1498_v26  ;;  %v422_v30 = vmax.f32 %v418_v25, 0.0  ;;  %v1250_v26 = vpack.c.bf16 %v824_v34, %v823_v33 }
 0x104   :  { %1243 = vmatprep.subr.bf16.mxu1 %v1242_v23 }
 0x105   :  { %1047 = vmatprep.mubr.f32.mxu1 %v422_v30  ;;  %1085 = vmatprep.mubr.f32.mxu0 %v422_v30 }
 0x106   :  { %1048 = vmatmul.mubr.f32.gmra.mrb[6].mxu1 %v423_v31  ;;  %1086 = vmatmul.mubr.f32.gmra.mrb[10].mxu0 %v423_v31 }
 0x107   :  { %1245 = vmatpush3.bf16.msra.mxu1 %v1242_v23  ;;  %1120 = vmatprep.mubr.f32.mxu1 %v420_v20 }
 0x108   :  { %1247 = vmatprep.subr.bf16.mxu1 %v1246_v32 }
 0x10b   :  { %1249 = vmatpush3.bf16.msra.mxu1 %v1246_v32 }
 0x10c   :  { %1251 = vmatprep.subr.bf16.mxu1 %v1250_v26 }
 0x10f   :  { %1253 = vmatpush3.bf16.msra.mxu1 %v1250_v26 }
 0x110   :  { %1255 = vmatprep.subr.bf16.mxu1 %v1254_v37 }
 0x113   :  { %1257 = vmatpush3.bf16.msra.mxu1 %v1254_v37 }
 0x114   :  { %1259 = vmatprep.subr.bf16.mxu1 %v1258_v40 }
 0x117   :  { %1261 = vmatpush3.bf16.msra.mxu1 %v1258_v40 }
 0x118   :  { %1263 = vmatprep.subr.bf16.mxu1 %v1262_v43 }
 0x11b   :  { %1265 = vmatpush3.bf16.msra.mxu1 %v1262_v43 }
 0x11c   :  { %1267 = vmatprep.subr.bf16.mxu1 %v1266_v46 }
 0x11f   :  { %1269 = vmatpush3.bf16.msra.mxu1 %v1266_v46 }
 0x122   :  { %1121 = vmatmul.mubr.f32.vlgmr.msra.gmra.mrb[8].mxu1 %v421_v22 }
 0x123   :  { %1123 = vmatprep.mubr.f32.mxu1 %v422_v30 }
 0x126   :  { %1124 = vmatmul.mubr.f32.gmra.mrb[10].mxu1 %v423_v31 }
 0x1d5   :  { %v1046_v47 = vpop.f32.mrb[4].mxu1  ;;  %v1084_v48 = vpop.f32.mrb[8].mxu0 }
 0x1d6   :  { %v653_v49 = vrot.slane %v1046_v47, 7  ;;  %v665_v50 = vrot.slane %v1084_v48, 1  ;;  %v531_v51 = vpop.f32.mrb[5].mxu1  ;;  %v633_v52 = vpop.f32.mrb[9].mxu0 }
 0x1d7   :  { %v652_v53 = vrot.slane %v531_v51, 7  ;;  %v664_v54 = vrot.slane %v633_v52, 1 }
 0x1d9   :  { %v670_v55 = vsel %vm311_vm2, %v664_v54, %v665_v50  ;;  %v1049_v56 = vpop.f32.mrb[6].mxu1  ;;  %v1087_v57 = vpop.f32.mrb[10].mxu0  ;;  %v658_v58 = vsel %vm298_vm1, %v652_v53, %v653_v49 }
 0x1da   :  { %v655_v59 = vrot.slane %v1049_v56, 7  ;;  %v667_v61 = vrot.slane %v1087_v57, 1  ;;  %v541_v63 = vpop.f32.mrb[7].mxu1  ;;  %v643_v0 = vpop.f32.mrb[11].mxu0 }
 0x1db   :  { %v654_v1 = vrot.slane %v541_v63, 7  ;;  %v666_v2 = vrot.slane %v643_v0, 1 }
 0x1dc   :  { %v671_v3 = vsel %vm311_vm2, %v667_v61, %v664_v54  ;;  %v659_v4 = vsel %vm298_vm1, %v655_v59, %v652_v53 }
 0x1dd   :  { %v668_v5 = vsel %vm311_vm2, %v666_v2, %v667_v61  ;;  %v669_v6 = vsel %vm311_vm2, %v665_v50, %v666_v2  ;;  %v656_v7 = vsel %vm298_vm1, %v654_v1, %v655_v59  ;;  %v657_v9 = vsel %vm298_vm1, %v653_v49, %v654_v1 }
 0x1de   :  { %v660_v17 = vsel %vm1528_vm3, %v659_v4, 0.0  ;;  %v673_v18 = vsel %vm1532_vm4, %v669_v6, 0.0  ;;  %v662_v29 = vsel %vm1540_vm5, %v657_v9, 0.0  ;;  %v675_v60 = vsel %vm1544_vm6, %v671_v3, 0.0 }
 0x1f5   :  { %v1122_v11 = vpop.f32.mrb[8].mxu1 }
 0x1f6   :  { %v755_v13 = vadd.f32 %v1122_v11, %v849_v10  ;;  %v749_v14 = vpop.f32.mrb[9].mxu1 }
 0x1f7   :  { %v750_v15 = vadd.f32 %v849_v10, %v749_v14 }
 0x1f8   :  { %v769_v16 = vadd.f32 %v755_v13, %v658_v58 }
 0x1f9   :  { %v768_v19 = vadd.f32 %v750_v15, %v660_v17  ;;  %v1125_v20 = vpop.f32.mrb[10].mxu1 }
 0x1fa   :  { %v773_v21 = vadd.f32 %v769_v16, %v673_v18  ;;  %v765_v28 = vadd.f32 %v1125_v20, %v849_v10  ;;  %v759_v22 = vpop.f32.mrb[11].mxu1 }
 0x1fb   :  { %v772_v23 = vadd.f32 %v768_v19, %v670_v55  ;;  %v760_v24 = vadd.f32 %v849_v10, %v759_v22 }
 0x1fc   :  { %v777_v25 = vmax.f32 %v773_v21, 0.0  ;;  %v771_v27 = vadd.f32 %v765_v28, %v656_v7 }
 0x1fd   :  { %v776_v30 = vmax.f32 %v772_v23, 0.0  ;;  %v770_v31 = vadd.f32 %v760_v24, %v662_v29 }
 0x1fe   :  { %781 = vst [vmem:[%s1639_s5 + $0x8] sm:$0xff] %v777_v25  ;;  %v775_v62 = vadd.f32 %v771_v27, %v675_v60 }
 0x1ff   :  { %780 = vst [vmem:[%s1639_s5] sm:$0xff] %v776_v30  ;;  %v774_v32 = vadd.f32 %v770_v31, %v668_v5 }
 0x200   :  { %v779_v33 = vmax.f32 %v775_v62, 0.0 }
 0x201   :  { %v778_v34 = vmax.f32 %v774_v32, 0.0 }
 0x202   :  { %783 = vst [vmem:[%s1639_s5 + $0x18] sm:$0xff] %v779_v33 }
 0x203   :  { %782 = vst [vmem:[%s1639_s5 + $0x10] sm:$0xff] %v778_v34 }

</bundles_post_ra>
